<compile_context>
chip_gen: v7x
topology: tpu7x:2x2x1
jax: 0.10.0
libtpu: 0.0.40
codegen_flags: <defaults>
</compile_context>

<pallas_src>
import jax
import jax.numpy as jnp
from jax.experimental import pallas as pl
from jax.experimental.pallas import tpu as pltpu


# ------------------------------- helpers ------------------------------------
def _round_up(x, m):
    return ((x + m - 1) // m) * m


def _tpu_generation_defaults():
    """(tile_m, tile_v, vmem_cap_bytes) tuned per TPU generation."""
    kind = ""
    try:
        kind = jax.devices()[0].device_kind.lower()
    except Exception:
        pass
    mib = 1024 * 1024
    if "v7" in kind or "7x" in kind:
        # ridge ~310 flop/byte but only 64 MiB VMEM per TensorCore; tile_v=1024
        # is the decode win (clamped back to tile_m for multi-block prefill).
        return 512, 1024, 56 * mib
    if "v6" in kind:
        # ridge ~700 flop/byte -> tile_m=1024 to go compute-bound; 128 MiB VMEM.
        return 1024, 512, 100 * mib
    if "v5" in kind:
        # ridge ~240 flop/byte -> tile_m=256 already compute-bound.
        return 256, 512, 100 * mib
    # Unknown chip: conservative middle ground.
    return 512, 512, 56 * mib


# ----------------------------- Pallas kernel --------------------------------
def _lm_head_kernel(x_ref, w_ref, o_ref):
    """LM-head matmul for one (token-block, vocab-block) tile.

    x_ref: (TM, H)   normalized hidden states (bf16), token block i
    w_ref: (H, TV)   LM-head weight tile (bf16), vocab block j
    o_ref: (TM, TV)  logits tile
    """
    o_ref[...] = jnp.dot(
        x_ref[...], w_ref[...],
        preferred_element_type=jnp.float32).astype(o_ref.dtype)


def lm_head_logits(xn, w_lm, *, tile_m=None, tile_v=None,
                   out_dtype=jnp.float32):
    """xn: [M, H] bf16 (already normalized), w_lm: [H, V] bf16 -> [M, V]."""
    M, H = xn.shape
    H2, V = w_lm.shape
    assert H == H2, "hidden-size mismatch between activations and LM head"

    dflt_m, dflt_v, vmem_cap = _tpu_generation_defaults()
    tile_m = dflt_m if tile_m is None else tile_m
    tile_v = dflt_v if tile_v is None else tile_v

    # Token-block axis: bf16 packs two rows per sublane -> tile_m % 16 == 0.
    # Pad M instead of asserting so decode batches of any size work.
    tile_m = max(16, _round_up(min(tile_m, _round_up(M, 16)), 16))
    m_pad = _round_up(M, tile_m)

    # Vocab axis: lane-dense, 128-aligned; pad V if it does not divide.
    tile_v = max(128, _round_up(min(tile_v, _round_up(V, 128)), 128))
    v_pad = _round_up(V, tile_v)

    # Prefill (several token blocks): keep tile_m >= tile_v so the block that
    # stays resident across the inner vocab sweep is the activation tile and
    # the full LM-head weight is streamed from HBM only m_pad/tile_m times.
    if m_pad > tile_m and tile_v > tile_m:
        tile_v = max(128, (tile_m // 128) * 128)
        v_pad = _round_up(V, tile_v)

    if m_pad != M:
        xn = jnp.pad(xn, ((0, m_pad - M), (0, 0)))
    if v_pad != V:
        w_lm = jnp.pad(w_lm, ((0, 0), (0, v_pad - V)))

    grid = (m_pad // tile_m, v_pad // tile_v)

    # Accurate double-buffered footprint + headroom, clamped per generation.
    out_isz = jnp.dtype(out_dtype).itemsize
    buf_bytes = 2 * (tile_m * H * xn.dtype.itemsize
                     + H * tile_v * w_lm.dtype.itemsize
                     + tile_m * tile_v * out_isz) + 2 * 1024 * 1024
    vmem_limit = int(min(max(buf_bytes, 32 * 1024 * 1024), vmem_cap))

    logits = pl.pallas_call(
        _lm_head_kernel,
        out_shape=jax.ShapeDtypeStruct((m_pad, v_pad), out_dtype),
        grid_spec=pltpu.PrefetchScalarGridSpec(
            num_scalar_prefetch=0,
            grid=grid,
            in_specs=[
                # token block of normalized hidden states (resident across j)
                pl.BlockSpec((tile_m, H), lambda i, j: (i, 0)),
                # vocab tile of the LM-head weight (weight streaming)
                pl.BlockSpec((H, tile_v), lambda i, j: (0, j)),
            ],
            out_specs=pl.BlockSpec((tile_m, tile_v), lambda i, j: (i, j)),
        ),
        compiler_params=pltpu.CompilerParams(
            dimension_semantics=("parallel", "parallel"),
            vmem_limit_bytes=vmem_limit),
    )(xn, w_lm)

    if m_pad != M or v_pad != V:
        logits = logits[:M, :V]
    return logits


# ------------------------- NeuronCasualLM analogue --------------------------
class NeuronCausalLMPallas:
    """Synthetic stand-in for the Neuron-compiled causal LM.

    forward(input_ids, positions, input_block_ids) -> logits [B, T, V]
    """

    def __init__(self, vocab_size=512, hidden_size=128, max_pos=64, seed=0):
        self.vocab_size = vocab_size
        self.hidden_size = hidden_size
        key = jax.random.PRNGKey(seed)
        k_tok, k_pos, k_lm = jax.random.split(key, 3)
        scale = 1.0 / jnp.sqrt(hidden_size)
        self.tok_emb = jax.random.normal(
            k_tok, (vocab_size, hidden_size), jnp.float32) * scale
        self.pos_emb = jax.random.normal(
            k_pos, (max_pos, hidden_size), jnp.float32) * scale
        self.gamma = jnp.ones((1, hidden_size), jnp.float32)
        # LM-head weight in bf16: the op is HBM-bound on weight traffic, so
        # bf16 halves bytes and matches the MXU's native rate.
        # TODO(synk): int8 (v5e/v6e) / fp8 (v7x) weight quantization with
        # per-channel scales would halve weight bytes again for decode.
        self.w_lm = (jax.random.normal(
            k_lm, (hidden_size, vocab_size), jnp.float32) * scale
        ).astype(jnp.bfloat16)

    def forward(self, input_ids, positions, input_block_ids,
                last_token_only=False, logits_dtype=jnp.float32):
        # TODO(synk): input_block_ids selects KV-cache blocks in the Neuron
        # runtime; there is no KV cache in this synthetic forward, so it is
        # accepted but unused.
        B, T = input_ids.shape
        H = self.hidden_size

        # Glue: embedding gathers (token + positional), plain JAX.
        h = self.tok_emb[input_ids] + self.pos_emb[positions]   # [B, T, H]
        h = h.reshape(B * T, H).astype(jnp.float32)

        # RMSNorm hoisted out of the kernel: computed once in f32, then cast
        # to bf16 for the MXU (f32 accumulation inside the kernel).
        var = jnp.mean(h * h, axis=-1, keepdims=True)
        xn = (h * jax.lax.rsqrt(var + 1e-6)) * self.gamma        # [M, H] f32
        xn = xn.astype(jnp.bfloat16)

        if last_token_only:
            # Serving-style prefill: project only the last position of each
            # sequence (cuts weight streaming by a factor of T).
            xn = xn.reshape(B, T, H)[:, -1, :]
            logits = lm_head_logits(xn, self.w_lm, out_dtype=logits_dtype)
            return logits.reshape(B, 1, self.vocab_size)

        logits = lm_head_logits(xn, self.w_lm, out_dtype=logits_dtype)
        return logits.reshape(B, T, self.vocab_size)

    def compute_logits(self, hidden_states):
        # LogitsProcessor(logits_as_input=True) is a pass-through.
        return hidden_states

    def sample(self, logits):
        # Greedy sampling over the last position's logits.
        return jnp.argmax(logits[:, -1, :], axis=-1)


# ------------------------------- reference ----------------------------------
def _reference_forward(model, input_ids, positions):
    h = model.tok_emb[input_ids] + model.pos_emb[positions]
    var = jnp.mean(h * h, axis=-1, keepdims=True)
    hn = (h * jax.lax.rsqrt(var + 1e-6) * model.gamma[0]).astype(jnp.bfloat16)
    return jnp.einsum("bth,hv->btv", hn, model.w_lm,
                      preferred_element_type=jnp.float32)


if __name__ == "__main__":
    B, T = 2, 8
    VOCAB, HIDDEN = 512, 128

    model = NeuronCausalLMPallas(vocab_size=VOCAB, hidden_size=HIDDEN,
                                 max_pos=64, seed=0)

    key = jax.random.PRNGKey(0)
    k_ids, _ = jax.random.split(key)
    input_ids = jax.random.randint(k_ids, (B, T), 0, VOCAB, dtype=jnp.int32)
    positions = jnp.broadcast_to(jnp.arange(T, dtype=jnp.int32), (B, T))
    input_block_ids = jnp.arange(B, dtype=jnp.int32)

    logits = model.forward(input_ids, positions, input_block_ids)
    logits = jax.block_until_ready(logits)

    ref = _reference_forward(model, input_ids, positions)
    assert logits.shape == (B, T, VOCAB)
    assert jnp.allclose(logits, ref, atol=1e-2, rtol=1e-2), \
        "mismatch vs reference"

    # Exercise the padding path with a decode-style odd batch (M=3 tokens).
    dec_ids = input_ids[:, :1]
    dec_pos = positions[:, :1]
    dec_logits = model.forward(dec_ids[:1], dec_pos[:1], input_block_ids[:1])
    dec_logits = jax.block_until_ready(dec_logits)
    dec_ref = _reference_forward(model, dec_ids[:1], dec_pos[:1])
    assert jnp.allclose(dec_logits, dec_ref, atol=1e-2, rtol=1e-2), \
        "decode-path mismatch vs reference"

    _ = jax.block_until_ready(model.sample(model.compute_logits(logits)))
    print("KERNEL_OK")
</pallas_src>

<mosaic_0001>
module attributes {stable_mosaic.version = 11 : i64} {
  func.func @_lm_head_kernel(%arg0: i32, %arg1: i32, %arg2: memref<16x128xbf16, #tpu.memory_space<vmem>>, %arg3: memref<128x512xbf16, #tpu.memory_space<vmem>>, %arg4: memref<16x512xf32, #tpu.memory_space<vmem>>) attributes {dimension_semantics = [#tpu.dimension_semantics<parallel>, #tpu.dimension_semantics<parallel>], iteration_bounds = array<i64: 1, 1>, scalar_prefetch = 0 : i64, scratch_operands = 0 : i64, tpu.core_type = #tpu.core_type<tc>, window_params = [{transform_indices = @transform_0, window_bounds = array<i64: 16, 128>}, {transform_indices = @transform_1, window_bounds = array<i64: 128, 512>}, {transform_indices = @transform_2, window_bounds = array<i64: 16, 512>}]} {
    %c0 = arith.constant 0 : index
    %c0_0 = arith.constant 0 : index
    %0 = vector.load %arg2[%c0, %c0_0] : memref<16x128xbf16, #tpu.memory_space<vmem>>, vector<16x128xbf16>
    %c0_1 = arith.constant 0 : index
    %c0_2 = arith.constant 0 : index
    %1 = vector.load %arg3[%c0_1, %c0_2] : memref<128x512xbf16, #tpu.memory_space<vmem>>, vector<128x512xbf16>
    %cst = arith.constant dense<0.000000e+00> : vector<16x512xf32>
    %2 = tpu.matmul %0, %1, %cst {dimension_numbers = #tpu.dot_dimension_numbers<[1], [0], [0], [1], [0, 0, 1, 1], [], []>} : vector<16x128xbf16>, vector<128x512xbf16>, vector<16x512xf32> -> vector<16x512xf32>
    %c0_3 = arith.constant 0 : index
    %c0_4 = arith.constant 0 : index
    %3 = vector.load %arg4[%c0_3, %c0_4] : memref<16x512xf32, #tpu.memory_space<vmem>>, vector<16x512xf32>
    tpu.vector_store %arg4[%c0_3, %c0_4], %2 {strides = array<i32>} : memref<16x512xf32, #tpu.memory_space<vmem>>, vector<16x512xf32>,
    return
  }
  func.func @transform_0(%arg0: i32, %arg1: i32) -> (i32, i32) {
    %c0_i32 = arith.constant 0 : i32
    %c0_i32_0 = arith.constant 0 : i32
    return %arg0, %c0_i32 : i32, i32
  }
  func.func @transform_1(%arg0: i32, %arg1: i32) -> (i32, i32) {
    %c0_i32 = arith.constant 0 : i32
    %c0_i32_0 = arith.constant 0 : i32
    return %c0_i32, %arg1 : i32, i32
  }
  func.func @transform_2(%arg0: i32, %arg1: i32) -> (i32, i32) {
    %c0_i32 = arith.constant 0 : i32
    return %arg0, %arg1 : i32, i32
  }
}

</mosaic_0001>

<bundles_post_ra>
// kernel: tpu_custom_call.1
= control target key start
LH: loop header
LB: loop body
LE: loop exit
PB: predicated region body
PF: predicated region fallthrough
CT: control target
= control target key end

     0   :  { %7 = vsyncpa [#allocation3], 0  ;;  %s578_s0 = inlined_call_operand.hbm [shape: bf16[16,128], index: 0, kind: input, shape index: {}]   ;;  %s579_s1 = inlined_call_operand.hbm [shape: bf16[128,512], index: 1, kind: input, shape index: {}]   ;;  %s580_s2 = inlined_call_operand.hbm [shape: f32[16,512], index: 2, kind: output, shape index: {}]  }
   0x1   :  { %8 = vsyncpa [#allocation6], 0 }
   0x2   :  { %9 = vsyncpa [#allocation4], 0  ;;  %s517_s9 = smov [#allocation2]   ;;  %s445_s13 = scalar_lea.hbm %s578_s0, 128 }
   0x3   :  { %s15_s10 = sshll.u32 %s517_s9, 4  ;;  %p446_p0 = scmp.ne.s32.totalorder %s578_s0, %s445_s13  ;;  %s16_s10 = int_to_ptr.vmem [resolvable:$true] %s15_s10 }
   0x4   :  { %p449_p1 = scmp.lt.u32.totalorder %s445_s13, %s578_s0 }
   0x6   :  { %p451_p2 = pnand %p449_p1, %p446_p0 }
   0x8   :  { %454 = shalt.err (!%p451_p2)
}
   0x9   :  { %s455_s18 = scalar_lea.vmem %s16_s10, 128  ;;  %p460_p4 = scmp.lt.s32.totalorder %s16_s10, %s16_s10 }
   0xa   :  { %p456_p3 = scmp.ne.s32.totalorder %s16_s10, %s455_s18  ;;  %p461_p5 = scmp.lt.s32.totalorder %s455_s18, %s455_s18 }
   0xc   :  { %p462_p6 = por %p461_p5, %p460_p4 }
   0xe   :  { %p463_p7 = pnand %p462_p6, %p456_p3 }
  0x10   :  { %466 = shalt.err (!%p463_p7)
}
  0x11   :  { %s518_s19 = smov 64   ;;  %s519_s20 = smov 4  }
  0x12   :  { %21 = dma.hbm_to_vmem [thread:$0]  %s578_s0, 128, %s16_s10, [#allocation3], %s518_s19, %s518_s19, %s519_s20  }
  0x13   :  { %s520_s23 = smov [#allocation5]   ;;  %s467_s27 = scalar_lea.hbm %s579_s1, 4096 }
  0x14   :  { %s27_s24 = sshll.u32 %s520_s23, 4  ;;  %p468_p8 = scmp.ne.s32.totalorder %s579_s1, %s467_s27  ;;  %s28_s24 = int_to_ptr.vmem [resolvable:$true] %s27_s24 }
  0x15   :  { %p471_p9 = scmp.lt.u32.totalorder %s467_s27, %s579_s1 }
  0x17   :  { %p473_p10 = pnand %p471_p9, %p468_p8 }
  0x19   :  { %476 = shalt.err (!%p473_p10)
}
  0x1a   :  { %s477_s4 = scalar_lea.vmem %s28_s24, 4096  ;;  %p482_p12 = scmp.lt.s32.totalorder %s28_s24, %s28_s24 }
  0x1b   :  { %p478_p11 = scmp.ne.s32.totalorder %s28_s24, %s477_s4  ;;  %p483_p13 = scmp.lt.s32.totalorder %s477_s4, %s477_s4 }
  0x1d   :  { %p484_p0 = por %p483_p13, %p482_p12 }
  0x1f   :  { %p485_p1 = pnand %p484_p0, %p478_p11 }
  0x21   :  { %488 = shalt.err (!%p485_p1)
}
  0x22   :  { %s521_s0 = smov 256   ;;  %s522_s5 = smov 16  }
  0x23   :  { %33 = dma.hbm_to_vmem [thread:$0]  %s579_s1, 4096, %s28_s24, [#allocation6], %s521_s0, %s521_s0, %s522_s5  }
  0x24   :  { %511 = dma.done.wait [#allocation3], 128  }
  0x25   :  { %512 = vsyncadd [#allocation3], 4294967168 }
  0x26   :  { %513 = dma.done.wait [#allocation6], 4096  }
  0x27   :  { %514 = vsyncadd [#allocation6], 4294963200  ;;  %v523_v0 = vmov 0   ;;  %v396_v1 = vld [vmem:[#allocation5 + $0x4] ss:$16 sps:$4 sm:$0xff]   ;;  %v444_v33 = vld [vmem:[#allocation2] sm:$0xff]  }
  0x28   :  { %273 = vmatprep.mubr.bf16.mxu0 %v523_v0  ;;  %316 = vmatprep.mubr.bf16.mxu1 %v523_v0  ;;  %v398_v2 = vld [vmem:[#allocation5 + $0xc] ss:$16 sps:$4 sm:$0xff]   ;;  %v400_v3 = vld [vmem:[#allocation5] ss:$16 sps:$4 sm:$0xff]   ;;  %v401_v4 = vld [vmem:[#allocation5 + $0x8] ss:$16 sps:$4 sm:$0xff]  }
  0x29   :  { %241 = vmatprep.subr.bf16.mxu0 %v396_v1  ;;  %284 = vmatprep.subr.bf16.mxu1 %v398_v2  ;;  %v402_v5 = vld [vmem:[#allocation5 + $0x24] ss:$16 sps:$4 sm:$0xff]   ;;  %v404_v6 = vld [vmem:[#allocation5 + $0x2c] ss:$16 sps:$4 sm:$0xff]   ;;  %v406_v7 = vld [vmem:[#allocation5 + $0x20] ss:$16 sps:$4 sm:$0xff]  }
  0x2a   :  { %242 = vmatpush1.bf16.msra.mxu0 %v400_v3  ;;  %285 = vmatpush1.bf16.msra.mxu1 %v401_v4  ;;  %v407_v8 = vld [vmem:[#allocation5 + $0x28] ss:$16 sps:$4 sm:$0xff]   ;;  %v408_v9 = vld [vmem:[#allocation5 + $0x44] ss:$16 sps:$4 sm:$0xff]   ;;  %v410_v10 = vld [vmem:[#allocation5 + $0x4c] ss:$16 sps:$4 sm:$0xff]  }
  0x2b   :  { %243 = vmatprep.subr.bf16.mxu0 %v402_v5  ;;  %286 = vmatprep.subr.bf16.mxu1 %v404_v6  ;;  %v412_v11 = vld [vmem:[#allocation5 + $0x40] ss:$16 sps:$4 sm:$0xff]   ;;  %v413_v12 = vld [vmem:[#allocation5 + $0x48] ss:$16 sps:$4 sm:$0xff]   ;;  %v414_v13 = vld [vmem:[#allocation5 + $0x64] ss:$16 sps:$4 sm:$0xff]  }
  0x2c   :  { %v416_v14 = vld [vmem:[#allocation5 + $0x6c] ss:$16 sps:$4 sm:$0xff]   ;;  %v418_v15 = vld [vmem:[#allocation5 + $0x60] ss:$16 sps:$4 sm:$0xff]   ;;  %v419_v16 = vld [vmem:[#allocation5 + $0x68] ss:$16 sps:$4 sm:$0xff]  }
  0x2d   :  { %v420_v17 = vld [vmem:[#allocation5 + $0x84] ss:$16 sps:$4 sm:$0xff]   ;;  %v422_v18 = vld [vmem:[#allocation5 + $0x8c] ss:$16 sps:$4 sm:$0xff]   ;;  %v424_v19 = vld [vmem:[#allocation5 + $0x80] ss:$16 sps:$4 sm:$0xff]  }
  0x2e   :  { %244 = vmatpush1.bf16.msra.mxu0 %v406_v7  ;;  %287 = vmatpush1.bf16.msra.mxu1 %v407_v8  ;;  %v425_v20 = vld [vmem:[#allocation5 + $0x88] ss:$16 sps:$4 sm:$0xff]   ;;  %v426_v21 = vld [vmem:[#allocation5 + $0xa4] ss:$16 sps:$4 sm:$0xff]   ;;  %v428_v22 = vld [vmem:[#allocation5 + $0xac] ss:$16 sps:$4 sm:$0xff]  }
  0x2f   :  { %245 = vmatprep.subr.bf16.mxu0 %v408_v9  ;;  %288 = vmatprep.subr.bf16.mxu1 %v410_v10  ;;  %v430_v23 = vld [vmem:[#allocation5 + $0xa0] ss:$16 sps:$4 sm:$0xff]   ;;  %v431_v24 = vld [vmem:[#allocation5 + $0xa8] ss:$16 sps:$4 sm:$0xff]   ;;  %v432_v25 = vld [vmem:[#allocation5 + $0xc4] ss:$16 sps:$4 sm:$0xff]  }
  0x30   :  { %v434_v26 = vld [vmem:[#allocation5 + $0xcc] ss:$16 sps:$4 sm:$0xff]   ;;  %v436_v27 = vld [vmem:[#allocation5 + $0xc0] ss:$16 sps:$4 sm:$0xff]   ;;  %v437_v28 = vld [vmem:[#allocation5 + $0xc8] ss:$16 sps:$4 sm:$0xff]  }
  0x31   :  { %v438_v29 = vld [vmem:[#allocation5 + $0xe4] ss:$16 sps:$4 sm:$0xff]   ;;  %v440_v30 = vld [vmem:[#allocation5 + $0xec] ss:$16 sps:$4 sm:$0xff]   ;;  %v442_v31 = vld [vmem:[#allocation5 + $0xe0] ss:$16 sps:$4 sm:$0xff]  }
  0x32   :  { %246 = vmatpush1.bf16.msra.mxu0 %v412_v11  ;;  %289 = vmatpush1.bf16.msra.mxu1 %v413_v12  ;;  %v443_v32 = vld [vmem:[#allocation5 + $0xe8] ss:$16 sps:$4 sm:$0xff]   ;;  %s524_s1 = smov [#allocation7]  }
  0x33   :  { %247 = vmatprep.subr.bf16.mxu0 %v414_v13  ;;  %290 = vmatprep.subr.bf16.mxu1 %v416_v14  ;;  %s340_s8 = sshll.u32 %s524_s1, 4  ;;  %s341_s8 = int_to_ptr.vmem [resolvable:$true] %s340_s8 }
  0x34   :  { %s489_s9 = scalar_lea.vmem %s341_s8, 1024  ;;  %p494_p3 = scmp.lt.s32.totalorder %s341_s8, %s341_s8 }
  0x35   :  { %p490_p2 = scmp.ne.s32.totalorder %s341_s8, %s489_s9  ;;  %p495_p4 = scmp.lt.s32.totalorder %s489_s9, %s489_s9 }
  0x36   :  { %248 = vmatpush1.bf16.msra.mxu0 %v418_v15  ;;  %291 = vmatpush1.bf16.msra.mxu1 %v419_v16 }
  0x37   :  { %249 = vmatprep.subr.bf16.mxu0 %v420_v17  ;;  %292 = vmatprep.subr.bf16.mxu1 %v422_v18  ;;  %p496_p5 = por %p495_p4, %p494_p3 }
  0x39   :  { %p497_p6 = pnand %p496_p5, %p490_p2 }
  0x3a   :  { %250 = vmatpush1.bf16.msra.mxu0 %v424_v19  ;;  %293 = vmatpush1.bf16.msra.mxu1 %v425_v20 }
  0x3b   :  { %251 = vmatprep.subr.bf16.mxu0 %v426_v21  ;;  %294 = vmatprep.subr.bf16.mxu1 %v428_v22 }
  0x3e   :  { %252 = vmatpush1.bf16.msra.mxu0 %v430_v23  ;;  %295 = vmatpush1.bf16.msra.mxu1 %v431_v24 }
  0x3f   :  { %253 = vmatprep.subr.bf16.mxu0 %v432_v25  ;;  %296 = vmatprep.subr.bf16.mxu1 %v434_v26 }
  0x42   :  { %254 = vmatpush1.bf16.msra.mxu0 %v436_v27  ;;  %297 = vmatpush1.bf16.msra.mxu1 %v437_v28 }
  0x43   :  { %255 = vmatprep.subr.bf16.mxu0 %v438_v29  ;;  %298 = vmatprep.subr.bf16.mxu1 %v440_v30 }
  0x46   :  { %256 = vmatpush1.bf16.msra.mxu0 %v442_v31  ;;  %299 = vmatpush1.bf16.msra.mxu1 %v443_v32 }
  0x49   :  { %274 = vmatmul.mubr.bf16.vlgmr.msra.gmra.mrb[0].mxu0 %v444_v33  ;;  %317 = vmatmul.mubr.bf16.vlgmr.msra.gmra.mrb[0].mxu1 %v444_v33 }
 0x11c   :  { %v275_v34 = vpop.f32.mrb[0].mxu0  ;;  %v318_v35 = vpop.f32.mrb[0].mxu1 }
 0x11d   :  { %327 = vst [vmem:[#allocation7] sm:$0xff] %v275_v34  ;;  %329 = vst [vmem:[#allocation7 + $0x10] sm:$0xff] %v318_v35  ;;  %v277_v36 = vpop.f32.mrb[1].mxu0  ;;  %v320_v37 = vpop.f32.mrb[1].mxu1 }
 0x11e   :  { %328 = vst [vmem:[#allocation7 + $0x8] sm:$0xff] %v277_v36  ;;  %330 = vst [vmem:[#allocation7 + $0x18] sm:$0xff] %v320_v37  ;;  %v279_v38 = vpop.f32.mrb[2].mxu0  ;;  %v322_v39 = vpop.f32.mrb[2].mxu1 }
 0x11f   :  { %331 = vst [vmem:[#allocation7 + $0x20] sm:$0xff] %v279_v38  ;;  %333 = vst [vmem:[#allocation7 + $0x30] sm:$0xff] %v322_v39  ;;  %v281_v40 = vpop.f32.mrb[3].mxu0  ;;  %v324_v41 = vpop.f32.mrb[3].mxu1 }
 0x120   :  { %332 = vst [vmem:[#allocation7 + $0x28] sm:$0xff] %v281_v40  ;;  %334 = vst [vmem:[#allocation7 + $0x38] sm:$0xff] %v324_v41 }
 0x121   :  { %500 = shalt.err (!%p497_p6)
}
 0x122   :  { %s501_s12 = scalar_lea.hbm %s580_s2, 1024 }
 0x123   :  { %p502_p7 = scmp.ne.s32.totalorder %s580_s2, %s501_s12  ;;  %p505_p8 = scmp.lt.u32.totalorder %s501_s12, %s580_s2 }
 0x125   :  { %p507_p9 = pnand %p505_p8, %p502_p7 }
 0x127   :  { %510 = shalt.err (!%p507_p9)
}
 0x128   :  { %s525_s17 = smov 512   ;;  %s526_s18 = smov 32  }
 0x129   :  { %346 = dma.vmem_to_hbm [thread:$0]  %s341_s8, 1024, %s580_s2, [#allocation4], %s525_s17, %s525_s17, %s526_s18  }
 0x12a   :  { %515 = dma.done.wait [#allocation4], 1024  }
 0x12b   :  { %516 = vsyncadd [#allocation4], 4294966272 }
 0x12c   :  { %350 = vsyncpa [#allocation3], 1 }
 0x12d   :  { %351 = vsyncpa [#allocation6], 1 }
 0x12e   :  { %352 = vsyncpa [#allocation4], 1 }

</bundles_post_ra>
